<compile_context>
chip_gen: v7x
topology: tpu7x:2x2x1
jax: 0.10.0
libtpu: 0.0.40
codegen_flags: <defaults>
</compile_context>

<pallas_src>
import functools
import math

import jax
import jax.numpy as jnp
from jax.experimental import pallas as pl
from jax.experimental.pallas import tpu as pltpu


def _temp_softmax_kernel(x_ref, o_ref, *, inv_temp, use_min):
    # x_ref / o_ref: (tile_rows, D) VMEM tiles; softmax over the last (lane) dim.
    x = x_ref[...].astype(jnp.float32)
    # Temperature folded into the exp argument (saves a full-tile VPU scale):
    #   softmax(x/t) == exp((x - m) * (1/t)) / sum(...)
    # with m = max(x) for t > 0 and m = min(x) for t < 0.
    if use_min:
        m = jnp.min(x, axis=-1, keepdims=True)
    else:
        m = jnp.max(x, axis=-1, keepdims=True)
    e = jnp.exp((x - m) * inv_temp)
    s = jnp.sum(e, axis=-1, keepdims=True)
    # Per-row reciprocal (only `tile_rows` elements) + one broadcast multiply
    # over the tile, instead of a full-tile f32 divide.
    inv_s = 1.0 / s
    o_ref[...] = (e * inv_s).astype(o_ref.dtype)


# ~2 MiB per VMEM tile buffer keeps the double-buffered in+out working set
# (plus f32 temporaries) well under the scoped-VMEM defaults on every
# generation (v5e 16 MiB, v6e 32 MiB, v7x 32/64 MiB).
_PER_BUFFER_BYTES = 2 * 1024 * 1024


def _choose_row_tile(num_rows, row_bytes):
    """Byte-budgeted row tile.

    Largest row count whose (rows x D) f32 footprint fits the per-buffer
    budget, rounded down to a multiple of 8 (required for a partial block
    dim).  If the whole array fits in one budget-sized tile, process it in a
    single grid step (full-extent block dims are always legal).
    """
    tr = max(1, _PER_BUFFER_BYTES // max(1, row_bytes))
    if tr >= num_rows:
        return int(num_rows)
    tr = max(8, (tr // 8) * 8)
    return int(min(tr, num_rows))


def temp_softmax(x, temp):
    """Pallas implementation of TempSoftmax.forward: softmax(x / temp, axis=-1)."""
    orig_shape = x.shape
    D = int(orig_shape[-1])
    R = int(math.prod(orig_shape[:-1])) if len(orig_shape) > 1 else 1
    x2 = x.reshape(R, D)

    itemsize = x2.dtype.itemsize
    # Size the tile against the f32 compute footprint (dominant when the
    # input is bf16/int8).
    row_bytes = D * max(itemsize, 4)
    tr = _choose_row_tile(R, row_bytes)
    grid = (pl.cdiv(R, tr),)

    # Rough VMEM working set: in + out tiles double-buffered + ~2 f32 temps.
    tile_bytes = tr * D * itemsize
    tile_f32_bytes = tr * D * 4
    est_vmem = 2 * 2 * tile_bytes + 2 * tile_f32_bytes
    # Explicit limit with headroom; capped at 64 MiB so it is valid on v7x.
    vmem_limit = int(min(max(32 * 1024 * 1024, 2 * est_vmem), 64 * 1024 * 1024))

    temp = float(temp)  # static module attribute, folded at trace time
    kernel = functools.partial(
        _temp_softmax_kernel, inv_temp=1.0 / temp, use_min=(temp < 0.0)
    )

    out2 = pl.pallas_call(
        kernel,
        out_shape=jax.ShapeDtypeStruct((R, D), x.dtype),
        grid_spec=pltpu.PrefetchScalarGridSpec(
            num_scalar_prefetch=0,
            grid=grid,
            in_specs=[pl.BlockSpec((tr, D), lambda i: (i, 0))],
            out_specs=pl.BlockSpec((tr, D), lambda i: (i, 0)),
        ),
        compiler_params=pltpu.CompilerParams(
            dimension_semantics=("parallel",),
            vmem_limit_bytes=vmem_limit,
        ),
    )(x2)

    return out2.reshape(orig_shape)


def reference(x, temp):
    return jax.nn.softmax(x / temp, axis=-1)


if __name__ == "__main__":
    key = jax.random.PRNGKey(0)

    # Small shapes consistent with the module: batch=2, seq=8, hidden=32.
    B, N, D = 2, 8, 32
    temp = 2.5

    x = jax.random.normal(key, (B, N, D), dtype=jnp.float32)

    out = temp_softmax(x, temp)
    out = jax.block_until_ready(out)

    ref = reference(x, temp)
    assert out.shape == (B, N, D)
    assert jnp.allclose(out, ref, atol=1e-5, rtol=1e-5)
    # Rows must sum to 1.
    assert jnp.allclose(jnp.sum(out, axis=-1), jnp.ones((B, N)), atol=1e-5)

    # Also exercise the negative-temperature path (min-subtraction branch).
    temp_neg = -1.5
    out_neg = jax.block_until_ready(temp_softmax(x, temp_neg))
    ref_neg = reference(x, temp_neg)
    assert jnp.allclose(out_neg, ref_neg, atol=1e-5, rtol=1e-5)

    print("KERNEL_OK")
</pallas_src>

<mosaic_0001>
module attributes {stable_mosaic.version = 11 : i64} {
  func.func @_temp_softmax_kernel(%arg0: i32, %arg1: memref<16x32xf32, #tpu.memory_space<vmem>>, %arg2: memref<16x32xf32, #tpu.memory_space<vmem>>) attributes {dimension_semantics = [#tpu.dimension_semantics<parallel>], iteration_bounds = array<i64: 1>, scalar_prefetch = 0 : i64, scratch_operands = 0 : i64, tpu.core_type = #tpu.core_type<tc>, window_params = [{transform_indices = @transform_0, window_bounds = array<i64: 16, 32>}, {transform_indices = @transform_1, window_bounds = array<i64: 16, 32>}]} {
    %c0 = arith.constant 0 : index
    %c0_0 = arith.constant 0 : index
    %0 = vector.load %arg1[%c0, %c0_0] : memref<16x32xf32, #tpu.memory_space<vmem>>, vector<16x32xf32>
    %cst = arith.constant dense<0xFF800000> : vector<16xf32>
    %1 = vector.multi_reduction <maximumf>, %0, %cst [1] : vector<16x32xf32> to vector<16xf32>
    %2 = vector.shape_cast %1 : vector<16xf32> to vector<16x1xf32>
    %3 = vector.broadcast %2 : vector<16x1xf32> to vector<16x32xf32>
    %4 = arith.subf %0, %3 : vector<16x32xf32>
    %cst_1 = arith.constant 4.000000e-01 : f32
    %5 = vector.broadcast %cst_1 : f32 to vector<16x32xf32>
    %6 = arith.mulf %4, %5 : vector<16x32xf32>
    %7 = math.exp %6 : vector<16x32xf32>
    %cst_2 = arith.constant dense<0.000000e+00> : vector<16xf32>
    %8 = vector.multi_reduction <add>, %7, %cst_2 [1] : vector<16x32xf32> to vector<16xf32>
    %9 = vector.shape_cast %8 : vector<16xf32> to vector<16x1xf32>
    %cst_3 = arith.constant 1.000000e+00 : f32
    %10 = vector.broadcast %cst_3 : f32 to vector<16x1xf32>
    %11 = arith.divf %10, %9 : vector<16x1xf32>
    %12 = vector.broadcast %11 : vector<16x1xf32> to vector<16x32xf32>
    %13 = arith.mulf %7, %12 : vector<16x32xf32>
    %c0_4 = arith.constant 0 : index
    %c0_5 = arith.constant 0 : index
    %14 = vector.load %arg2[%c0_4, %c0_5] : memref<16x32xf32, #tpu.memory_space<vmem>>, vector<16x32xf32>
    tpu.vector_store %arg2[%c0_4, %c0_5], %13 {strides = array<i32>} : memref<16x32xf32, #tpu.memory_space<vmem>>, vector<16x32xf32>,
    return
  }
  func.func @transform_0(%arg0: i32) -> (i32, i32) {
    %c0_i32 = arith.constant 0 : i32
    %c0_i32_0 = arith.constant 0 : i32
    return %arg0, %c0_i32 : i32, i32
  }
  func.func @transform_1(%arg0: i32) -> (i32, i32) {
    %c0_i32 = arith.constant 0 : i32
    %c0_i32_0 = arith.constant 0 : i32
    return %arg0, %c0_i32 : i32, i32
  }
}

</mosaic_0001>

<bundles_post_ra>
// kernel: tpu_custom_call.1
= control target key start
LH: loop header
LB: loop body
LE: loop exit
PB: predicated region body
PF: predicated region fallthrough
CT: control target
= control target key end

     0   :  { %6 = vsyncpa [#allocation3], 0  ;;  %s181_s0 = inlined_call_operand.hbm [shape: f32[16,32], index: 0, kind: input, shape index: {}]   ;;  %s182_s1 = inlined_call_operand.hbm [shape: f32[16,32], index: 1, kind: output, shape index: {}]  }
   0x1   :  { %7 = vsyncpa [#allocation4], 0  ;;  %s131_s6 = smov [#allocation2]   ;;  %s83_s10 = scalar_lea.hbm %s181_s0, 256 }
   0x2   :  { %s13_s7 = sshll.u32 %s131_s6, 4  ;;  %p84_p0 = scmp.ne.s32.totalorder %s181_s0, %s83_s10  ;;  %s14_s7 = int_to_ptr.vmem [resolvable:$true] %s13_s7 }
   0x3   :  { %p87_p1 = scmp.lt.u32.totalorder %s83_s10, %s181_s0 }
   0x5   :  { %p89_p2 = pnand %p87_p1, %p84_p0 }
   0x7   :  { %92 = shalt.err (!%p89_p2)
}
   0x8   :  { %s93_s15 = scalar_lea.vmem %s14_s7, 256  ;;  %p98_p4 = scmp.lt.s32.totalorder %s14_s7, %s14_s7 }
   0x9   :  { %p94_p3 = scmp.ne.s32.totalorder %s14_s7, %s93_s15  ;;  %p99_p5 = scmp.lt.s32.totalorder %s93_s15, %s93_s15 }
   0xb   :  { %p100_p6 = por %p99_p5, %p98_p4 }
   0xd   :  { %p101_p7 = pnand %p100_p6, %p94_p3 }
   0xf   :  { %104 = shalt.err (!%p101_p7)
}
  0x10   :  { %s132_s16 = smov 128   ;;  %s133_s17 = smov 8  }
  0x11   :  { %19 = dma.hbm_to_vmem [thread:$0]  %s181_s0, 256, %s14_s7, [#allocation3], %s132_s16, %s132_s16, %s133_s17  }
  0x12   :  { %127 = dma.done.wait [#allocation3], 256  }
  0x13   :  { %128 = vsyncadd [#allocation3], 4294967040  ;;  %vm25_vm0 = vcmask 261120   ;;  %v23_v0 = vld [vmem:[#allocation2] sm:$0xff]  ;;  %v24_v1 = vld [vmem:[#allocation2 + $0x8] sm:$0xff]  ;;  %s134_s0 = smov [#allocation5]  }
  0x14   :  { %v26_v2 = vsel %vm25_vm0, %v23_v0, -inf  ;;  %v29_v3 = vsel %vm25_vm0, %v24_v1, -inf  ;;  %s59_s20 = sshll.u32 %s134_s0, 4  ;;  %s60_s20 = int_to_ptr.vmem [resolvable:$true] %s59_s20 }
  0x15   :  { %27 = vmax.xlane.f32.xlu0 %v26_v2  ;;  %s105_s21 = scalar_lea.vmem %s60_s20, 256  ;;  %p110_p9 = scmp.lt.s32.totalorder %s60_s20, %s60_s20 }
  0x16   :  { %p106_p8 = scmp.ne.s32.totalorder %s60_s20, %s105_s21  ;;  %p111_p10 = scmp.lt.s32.totalorder %s105_s21, %s105_s21 }
  0x18   :  { %p112_p11 = por %p111_p10, %p110_p9 }
  0x19   :  { %30 = vmax.xlane.f32.xlu0 %v29_v3 }
  0x1a   :  { %p113_p12 = pnand %p112_p11, %p106_p8 }
  0xa2   :  { %v28_v4 = vpop.xlane.xlu0 %27 }
  0xa3   :  { %v32_v5 = vsub.f32 %v23_v0, %v28_v4 }
  0xa5   :  { %v34_v6 = vmul.f32 0.4, %v32_v5 }
  0xa6   :  { %v31_v7 = vpop.xlane.xlu0 %30 }
  0xa7   :  { %v36_v8 = vmul.f32 1.442695, %v34_v6  ;;  %v33_v9 = vsub.f32 %v24_v1, %v31_v7 }
  0xa9   :  { %75 = vpow2.f32 %v36_v8  ;;  %v35_v10 = vmul.f32 0.4, %v33_v9 }
  0xab   :  { %v38_v11 = vmul.f32 1.442695, %v35_v10 }
  0xad   :  { %77 = vpow2.f32 %v38_v11 }
  0xb3   :  { %v76_v12 = vpop.eup %75 }
  0xb4   :  { %v40_v13 = vsel %vm25_vm0, %v76_v12, 0.0 }
  0xb5   :  { %41 = vadd.xlane.f32.xlu1 %v40_v13 }
  0xb7   :  { %v78_v14 = vpop.eup %77 }
  0xb8   :  { %v43_v15 = vsel %vm25_vm0, %v78_v14, 0.0 }
  0xb9   :  { %44 = vadd.xlane.f32.xlu1 %v43_v15 }
 0x142   :  { %v42_v16 = vpop.xlane.xlu1 %41 }
 0x143   :  { %79 = vrcp.f32 %v42_v16 }
 0x146   :  { %v45_v17 = vpop.xlane.xlu1 %44 }
 0x147   :  { %81 = vrcp.f32 %v45_v17 }
 0x14d   :  { %v80_v18 = vpop.eup %79 }
 0x14e   :  { %v50_v19 = vmul.f32 %v80_v18, %v76_v12 }
 0x150   :  { %52 = vst.msk [vmem:[#allocation5] sm:$0xff] %vm25_vm0, %v50_v19 }
 0x151   :  { %v82_v20 = vpop.eup %81 }
 0x152   :  { %v51_v21 = vmul.f32 %v82_v20, %v78_v14 }
 0x154   :  { %53 = vst.msk [vmem:[#allocation5 + $0x8] sm:$0xff] %vm25_vm0, %v51_v21 }
 0x155   :  { %116 = shalt.err (!%p113_p12)
}
 0x156   :  { %s117_s24 = scalar_lea.hbm %s182_s1, 256 }
 0x157   :  { %p118_p13 = scmp.ne.s32.totalorder %s182_s1, %s117_s24  ;;  %p121_p0 = scmp.lt.u32.totalorder %s117_s24, %s182_s1 }
 0x159   :  { %p123_p1 = pnand %p121_p0, %p118_p13 }
 0x15b   :  { %126 = shalt.err (!%p123_p1)
}
 0x15c   :  { %65 = dma.vmem_to_hbm [thread:$0]  %s60_s20, 256, %s182_s1, [#allocation4], %s132_s16, %s132_s16, %s133_s17  }
 0x15d   :  { %129 = dma.done.wait [#allocation4], 256  }
 0x15e   :  { %130 = vsyncadd [#allocation4], 4294967040 }
 0x15f   :  { %69 = vsyncpa [#allocation3], 1 }
 0x160   :  { %70 = vsyncpa [#allocation4], 1 }

</bundles_post_ra>
